<compile_context>
chip_gen: v5e
topology: v5e:2x2
jax: 0.10.0
libtpu: 0.0.40
codegen_flags: <defaults>
</compile_context>

<pallas_src>
import jax
import jax.numpy as jnp
from jax.experimental import pallas as pl
from jax.experimental.pallas import tpu as pltpu


def _round_up(n, m):
    return ((n + m - 1) // m) * m


def _vmem_limit_bytes():
    """Per-generation VMEM limit: ~96 MiB on 128 MiB parts, ~48 MiB on 64 MiB parts."""
    cap = 64 * 1024 * 1024  # conservative fallback (v7x per-TC physical VMEM)
    try:
        info = pltpu.get_tpu_info()
        c = getattr(info, "vmem_capacity_bytes", None)
        if c:
            cap = int(c)
    except Exception:
        pass
    return min(cap, max(cap - 32 * 1024 * 1024, (3 * cap) // 4))


def mlp_kernel(x_ref, w1_ref, b1_ref, w2_ref, b2_ref, o_ref, acc_ref):
    j = pl.program_id(1)

    @pl.when(j == 0)
    def _():
        acc_ref[...] = jnp.zeros_like(acc_ref)

    # fc1 chunk: (tb, in) @ (in, th) + (1, th), then ReLU.  ReLU is elementwise per
    # hidden unit, so chunking over hidden is exact.
    h = jnp.dot(x_ref[...], w1_ref[...], preferred_element_type=jnp.float32)
    h = jnp.maximum(h + b1_ref[...], 0.0)

    # fc2 chunk: accumulate (tb, th) @ (th, out) into the f32 scratch.  The astype is
    # a no-op for f32 weights; for bf16 weights it feeds the bf16 MXU path (still
    # accumulating in f32).
    acc_ref[...] += jnp.dot(h.astype(w2_ref.dtype), w2_ref[...],
                            preferred_element_type=jnp.float32)

    @pl.when(j == pl.num_programs(1) - 1)
    def _():
        o_ref[...] = (acc_ref[...] + b2_ref[...]).astype(o_ref.dtype)


def single_layer_mlp(x, w1, b1, w2, b2, *, block_b=None, block_h=None):
    """Fused MLP forward.

    x:  (B, input_size)
    w1: (input_size, hidden_size)   b1: (1, hidden_size)
    w2: (hidden_size, output_size)  b2: (1, output_size)
    returns (B, output_size), same dtype as x.
    """
    B, in_size = x.shape
    hidden = w1.shape[1]
    out_size = w2.shape[1]
    itemsize = jnp.dtype(x.dtype).itemsize

    LANE = 128
    # Sub-32-bit dtypes pack along sublanes: minimum efficient batch-tile granularity
    # is 8 rows (f32), 16 (bf16/f16), 32 (int8/fp8).
    sub = {4: 8, 2: 16, 1: 32}.get(itemsize, 8)

    vmem_limit = _vmem_limit_bytes()
    budget = int(vmem_limit * 0.9)      # headroom for compiler-internal scratch

    in_p = _round_up(in_size, LANE)
    out_p = _round_up(out_size, LANE)

    def weights_bytes(bh):
        # Double-buffered W1 / b1 / W2 chunks + b2 (b1/b2 padded to >=8 sublanes).
        return (2 * (in_p * bh + bh * out_p + 8 * bh) * itemsize
                + 2 * 8 * out_p * itemsize)

    def tile_bytes(bb, bh):
        io = 2 * bb * (in_p + out_p) * itemsize   # double-buffered x / out tiles
        acc = bb * out_p * 4                      # f32 accumulator scratch
        h = bb * bh * 4                           # f32 fc1 intermediate (upper bound)
        return io + acc + h

    # --- hidden-chunk width: keep weights fully resident when they fit. ----------
    if block_h is None:
        full = _round_up(hidden, LANE)
        if weights_bytes(full) + tile_bytes(sub, full) <= budget:
            block_h = full                         # weights resident across all tiles
        else:
            bh = _round_up(full, 256)              # 256-aligned chunks (MXU width)
            while bh > 256 and weights_bytes(bh) + tile_bytes(sub, bh) > budget:
                bh = _round_up(bh // 2, 256)
            block_h = bh
    assert block_h % LANE == 0, "block_h must be a multiple of 128"
    hid_p = _round_up(hidden, block_h)

    # --- batch tile: as large as the budget allows (fewer steps, fewer weight
    #     re-streams when hidden is chunked), dtype-aware granularity. -------------
    B_ceil = _round_up(B, sub)
    if block_b is None:
        block_b = sub
        for cand in (B_ceil, 2048, 1024, 512, 256, 128, 64, 32, 16, 8):
            if cand % sub or cand > B_ceil or cand < sub:
                continue
            if weights_bytes(block_h) + tile_bytes(cand, block_h) <= budget:
                block_b = cand
                break
        # Ensure >= 2 batch tiles when possible so the "parallel" axis actually
        # shards across v7x's two TensorCores (harmless extra step on v5e/v6e).
        while (B + block_b - 1) // block_b < 2 and block_b >= 2 * sub:
            block_b = _round_up(block_b // 2, sub)
    assert block_b % sub == 0, f"block_b must be a multiple of {sub} for this dtype"
    B_pad = _round_up(B, block_b)

    # --- zero-pad everything to lane/sublane-aligned shapes (exact). -------------
    def pad2(a, rows, cols):
        pr, pc = rows - a.shape[0], cols - a.shape[1]
        if pr or pc:
            a = jnp.pad(a, ((0, pr), (0, pc)))
        return a

    x_p = pad2(x, B_pad, in_p)
    w1_p = pad2(w1, in_p, hid_p)
    b1_p = pad2(b1, 1, hid_p)
    w2_p = pad2(w2, hid_p, out_p)
    b2_p = pad2(b2, 1, out_p)

    n_b = B_pad // block_b
    n_h = hid_p // block_h
    grid = (n_b, n_h)

    # Honest HBM-traffic estimate: W1/b1/W2 are re-streamed once per batch tile when
    # the hidden dimension is chunked; fetched once when resident (n_h == 1).
    w_stream = n_b if n_h > 1 else 1
    flops = 2 * B_pad * (in_p * hid_p + hid_p * out_p)
    bytes_accessed = ((x_p.size + B_pad * out_p) * itemsize
                      + (w1_p.size + b1_p.size + w2_p.size) * itemsize * w_stream
                      + b2_p.size * itemsize)
    cost = pl.CostEstimate(flops=flops, transcendentals=0,
                           bytes_accessed=bytes_accessed)

    out_padded = pl.pallas_call(
        mlp_kernel,
        out_shape=jax.ShapeDtypeStruct((B_pad, out_p), x.dtype),
        grid_spec=pltpu.PrefetchScalarGridSpec(
            num_scalar_prefetch=0,
            grid=grid,
            in_specs=[
                pl.BlockSpec((block_b, in_p), lambda i, j: (i, 0)),   # x tile
                pl.BlockSpec((in_p, block_h), lambda i, j: (0, j)),   # W1 chunk
                pl.BlockSpec((1, block_h), lambda i, j: (0, j)),      # b1 chunk
                pl.BlockSpec((block_h, out_p), lambda i, j: (j, 0)),  # W2 chunk
                pl.BlockSpec((1, out_p), lambda i, j: (0, 0)),        # b2
            ],
            out_specs=pl.BlockSpec((block_b, out_p), lambda i, j: (i, 0)),
            scratch_shapes=[pltpu.VMEM((block_b, out_p), jnp.float32)],
        ),
        compiler_params=pltpu.CompilerParams(
            dimension_semantics=("parallel", "arbitrary"),
            vmem_limit_bytes=vmem_limit,
        ),
        cost_estimate=cost,
    )(x_p, w1_p, b1_p, w2_p, b2_p)

    return out_padded[:B, :out_size]


def init_linear_params(key, in_features, out_features, dtype=jnp.float32):
    """PyTorch nn.Linear-style init: U(-1/sqrt(fan_in), 1/sqrt(fan_in)).
    Weight is returned already transposed to (in_features, out_features)."""
    kw, kb = jax.random.split(key)
    bound = 1.0 / (in_features ** 0.5)
    w = jax.random.uniform(kw, (in_features, out_features), dtype,
                           minval=-bound, maxval=bound)
    b = jax.random.uniform(kb, (1, out_features), dtype,
                           minval=-bound, maxval=bound)
    return w, b


def _reference(x, w1, b1, w2, b2):
    hp = jax.lax.Precision.HIGHEST
    h = jnp.maximum(jnp.dot(x, w1, precision=hp) + b1, 0.0)
    return jnp.dot(h, w2, precision=hp) + b2


if __name__ == "__main__":
    key = jax.random.PRNGKey(0)

    # --- test 1: tiny binary-classifier shapes (the module's intended use). ------
    batch, input_size, hidden_size, output_size = 8, 32, 32, 2
    kx, k1, k2, key = jax.random.split(key, 4)
    x = jax.random.normal(kx, (batch, input_size), jnp.float32)
    w1, b1 = init_linear_params(k1, input_size, hidden_size)
    w2, b2 = init_linear_params(k2, hidden_size, output_size)

    out = jax.block_until_ready(single_layer_mlp(x, w1, b1, w2, b2))
    ref = _reference(x, w1, b1, w2, b2)
    assert out.shape == (batch, output_size)
    assert jnp.allclose(out, ref, atol=1e-5, rtol=1e-5)

    # --- test 2: ragged / unaligned shapes exercising padding, batch tiling and
    #     the hidden-chunk accumulator (forced block_h=128 -> 3 hidden chunks). ----
    batch2, in2, hid2, out2 = 48, 200, 300, 10
    kx, k1, k2, key = jax.random.split(key, 4)
    x2 = jax.random.normal(kx, (batch2, in2), jnp.float32)
    w1b, b1b = init_linear_params(k1, in2, hid2)
    w2b, b2b = init_linear_params(k2, hid2, out2)

    out2_arr = jax.block_until_ready(
        single_layer_mlp(x2, w1b, b1b, w2b, b2b, block_h=128))
    ref2 = _reference(x2, w1b, b1b, w2b, b2b)
    assert out2_arr.shape == (batch2, out2)
    assert jnp.allclose(out2_arr, ref2, atol=1e-4, rtol=1e-4)

    # --- test 3: default (auto) tiling on the same ragged shapes: full-hidden
    #     resident weights, >=2 batch tiles for the parallel axis. ----------------
    out3 = jax.block_until_ready(single_layer_mlp(x2, w1b, b1b, w2b, b2b))
    assert jnp.allclose(out3, ref2, atol=1e-4, rtol=1e-4)

    print("KERNEL_OK")
</pallas_src>

<mosaic_0001>
module attributes {stable_mosaic.version = 11 : i64} {
  func.func @mlp_kernel(%arg0: i32, %arg1: i32, %arg2: memref<8x128xf32, #tpu.memory_space<vmem>>, %arg3: memref<128x128xf32, #tpu.memory_space<vmem>>, %arg4: memref<1x128xf32, #tpu.memory_space<vmem>>, %arg5: memref<128x128xf32, #tpu.memory_space<vmem>>, %arg6: memref<1x128xf32, #tpu.memory_space<vmem>>, %arg7: memref<8x128xf32, #tpu.memory_space<vmem>>, %arg8: memref<8x128xf32, #tpu.memory_space<vmem>>) attributes {dimension_semantics = [#tpu.dimension_semantics<parallel>, #tpu.dimension_semantics<arbitrary>], iteration_bounds = array<i64: 1, 1>, scalar_prefetch = 0 : i64, scratch_operands = 1 : i64, tpu.core_type = #tpu.core_type<tc>, window_params = [{transform_indices = @transform_0, window_bounds = array<i64: 8, 128>}, {transform_indices = @transform_1, window_bounds = array<i64: 128, 128>}, {transform_indices = @transform_2, window_bounds = array<i64: 1, 128>}, {transform_indices = @transform_3, window_bounds = array<i64: 128, 128>}, {pipeline_mode = #tpu.pipeline_mode<synchronous>, transform_indices = @transform_4, window_bounds = array<i64: 1, 128>}, {transform_indices = @transform_5, window_bounds = array<i64: 8, 128>}]} {
    %c0_i32 = arith.constant 0 : i32
    %0 = arith.cmpi eq, %arg1, %c0_i32 : i32
    %1 = arith.extui %0 : i1 to i32
    %c0_i32_0 = arith.constant 0 : i32
    %2 = arith.cmpi ne, %1, %c0_i32_0 : i32
    scf.if %2 {
      %cst_16 = arith.constant 0.000000e+00 : f32
      %19 = vector.broadcast %cst_16 : f32 to vector<8x128xf32>
      %c0_17 = arith.constant 0 : index
      %c0_18 = arith.constant 0 : index
      %20 = vector.load %arg8[%c0_17, %c0_18] : memref<8x128xf32, #tpu.memory_space<vmem>>, vector<8x128xf32>
      tpu.vector_store %arg8[%c0_17, %c0_18], %19 {strides = array<i32>} : memref<8x128xf32, #tpu.memory_space<vmem>>, vector<8x128xf32>,
    } else {
    }
    %c0 = arith.constant 0 : index
    %c0_1 = arith.constant 0 : index
    %3 = vector.load %arg2[%c0, %c0_1] : memref<8x128xf32, #tpu.memory_space<vmem>>, vector<8x128xf32>
    %c0_2 = arith.constant 0 : index
    %c0_3 = arith.constant 0 : index
    %4 = vector.load %arg3[%c0_2, %c0_3] : memref<128x128xf32, #tpu.memory_space<vmem>>, vector<128x128xf32>
    %cst = arith.constant dense<0.000000e+00> : vector<8x128xf32>
    %5 = tpu.matmul %3, %4, %cst {dimension_numbers = #tpu.dot_dimension_numbers<[1], [0], [0], [1], [0, 0, 1, 1], [], []>} : vector<8x128xf32>, vector<128x128xf32>, vector<8x128xf32> -> vector<8x128xf32>
    %c0_4 = arith.constant 0 : index
    %c0_5 = arith.constant 0 : index
    %6 = vector.load %arg4[%c0_4, %c0_5] : memref<1x128xf32, #tpu.memory_space<vmem>>, vector<1x128xf32>
    %7 = vector.broadcast %6 : vector<1x128xf32> to vector<8x128xf32>
    %8 = arith.addf %5, %7 : vector<8x128xf32>
    %cst_6 = arith.constant 0.000000e+00 : f32
    %9 = vector.broadcast %cst_6 : f32 to vector<8x128xf32>
    %10 = arith.maximumf %8, %9 : vector<8x128xf32>
    %c0_7 = arith.constant 0 : index
    %c0_8 = arith.constant 0 : index
    %11 = vector.load %arg8[%c0_7, %c0_8] : memref<8x128xf32, #tpu.memory_space<vmem>>, vector<8x128xf32>
    %c0_9 = arith.constant 0 : index
    %c0_10 = arith.constant 0 : index
    %12 = vector.load %arg5[%c0_9, %c0_10] : memref<128x128xf32, #tpu.memory_space<vmem>>, vector<128x128xf32>
    %cst_11 = arith.constant dense<0.000000e+00> : vector<8x128xf32>
    %13 = tpu.matmul %10, %12, %cst_11 {dimension_numbers = #tpu.dot_dimension_numbers<[1], [0], [0], [1], [0, 0, 1, 1], [], []>} : vector<8x128xf32>, vector<128x128xf32>, vector<8x128xf32> -> vector<8x128xf32>
    %14 = arith.addf %11, %13 : vector<8x128xf32>
    %c0_12 = arith.constant 0 : index
    %c0_13 = arith.constant 0 : index
    %15 = vector.load %arg8[%c0_12, %c0_13] : memref<8x128xf32, #tpu.memory_space<vmem>>, vector<8x128xf32>
    tpu.vector_store %arg8[%c0_12, %c0_13], %14 {strides = array<i32>} : memref<8x128xf32, #tpu.memory_space<vmem>>, vector<8x128xf32>,
    %c0_i32_14 = arith.constant 0 : i32
    %16 = arith.cmpi eq, %arg1, %c0_i32_14 : i32
    %17 = arith.extui %16 : i1 to i32
    %c0_i32_15 = arith.constant 0 : i32
    %18 = arith.cmpi ne, %17, %c0_i32_15 : i32
    scf.if %18 {
      %c0_16 = arith.constant 0 : index
      %c0_17 = arith.constant 0 : index
      %19 = vector.load %arg8[%c0_16, %c0_17] : memref<8x128xf32, #tpu.memory_space<vmem>>, vector<8x128xf32>
      %c0_18 = arith.constant 0 : index
      %c0_19 = arith.constant 0 : index
      %20 = vector.load %arg6[%c0_18, %c0_19] : memref<1x128xf32, #tpu.memory_space<vmem>>, vector<1x128xf32>
      %21 = vector.broadcast %20 : vector<1x128xf32> to vector<8x128xf32>
      %22 = arith.addf %19, %21 : vector<8x128xf32>
      %c0_20 = arith.constant 0 : index
      %c0_21 = arith.constant 0 : index
      %23 = vector.load %arg7[%c0_20, %c0_21] : memref<8x128xf32, #tpu.memory_space<vmem>>, vector<8x128xf32>
      tpu.vector_store %arg7[%c0_20, %c0_21], %22 {strides = array<i32>} : memref<8x128xf32, #tpu.memory_space<vmem>>, vector<8x128xf32>,
    } else {
    }
    return
  }
  func.func @transform_0(%arg0: i32, %arg1: i32) -> (i32, i32) {
    %c0_i32 = arith.constant 0 : i32
    %c0_i32_0 = arith.constant 0 : i32
    return %arg0, %c0_i32 : i32, i32
  }
  func.func @transform_1(%arg0: i32, %arg1: i32) -> (i32, i32) {
    %c0_i32 = arith.constant 0 : i32
    %c0_i32_0 = arith.constant 0 : i32
    return %c0_i32, %arg1 : i32, i32
  }
  func.func @transform_2(%arg0: i32, %arg1: i32) -> (i32, i32) {
    %c0_i32 = arith.constant 0 : i32
    %c0_i32_0 = arith.constant 0 : i32
    return %c0_i32, %arg1 : i32, i32
  }
  func.func @transform_3(%arg0: i32, %arg1: i32) -> (i32, i32) {
    %c0_i32 = arith.constant 0 : i32
    %c0_i32_0 = arith.constant 0 : i32
    return %arg1, %c0_i32 : i32, i32
  }
  func.func @transform_4(%arg0: i32, %arg1: i32) -> (i32, i32) {
    %c0_i32 = arith.constant 0 : i32
    %c0_i32_0 = arith.constant 0 : i32
    %c0_i32_1 = arith.constant 0 : i32
    return %c0_i32, %c0_i32_0 : i32, i32
  }
  func.func @transform_5(%arg0: i32, %arg1: i32) -> (i32, i32) {
    %c0_i32 = arith.constant 0 : i32
    %c0_i32_0 = arith.constant 0 : i32
    return %arg0, %c0_i32 : i32, i32
  }
}

</mosaic_0001>

<bundles_post_ra>
// kernel: tpu_custom_call.1
= control target key start
LH: loop header
LB: loop body
LE: loop exit
PB: predicated region body
PF: predicated region fallthrough
CT: control target
= control target key end

     0   :  { %10 = vsyncpa [#allocation4], 0  ;;  %s344_s0 = inlined_call_operand.hbm [shape: f32[8,128], index: 0, kind: input, shape index: {}]   ;;  %s345_s1 = inlined_call_operand.hbm [shape: f32[128,128], index: 1, kind: input, shape index: {}]   ;;  %s346_s2 = inlined_call_operand.vmem [shape: f32[1,128], index: 2, kind: input, shape index: {}]   ;;  %s347_s3 = inlined_call_operand.hbm [shape: f32[128,128], index: 3, kind: input, shape index: {}]   ;;  %s348_s4 = inlined_call_operand.vmem [shape: f32[1,128], index: 4, kind: input, shape index: {}]   ;;  %s349_s5 = inlined_call_operand.hbm [shape: f32[8,128], index: 5, kind: output, shape index: {}]  }
   0x1   :  { %11 = vsyncpa [#allocation7], 0  ;;  %s28_s20 = sshll.u32 %s345_s1, 4  ;;  %s29_s20 = int_to_ptr.hbm [resolvable:$true] %s28_s20 }
   0x2   :  { %12 = vsyncpa [#allocation5], 0  ;;  %s290_s21 = smov [#allocation6]   ;;  %s18_s25 = sshll.u32 %s344_s0, 4  ;;  %s19_s25 = int_to_ptr.hbm [resolvable:$true] %s18_s25 }
   0x3   :  { %s30_s22 = sshll.u32 %s290_s21, 4  ;;  %s291_s26 = smov 128   ;;  %s31_s22 = int_to_ptr.vmem [resolvable:$true] %s30_s22 }
   0x4   :  { %s292_s27 = smov 8   ;;  %s293_s28 = smov [#allocation3]  }
   0x5   :  { %36 = dma.hbm_to_vmem [thread:$0]  %s29_s20, 2048, %s31_s22, [#allocation7], %s291_s26, %s291_s26, %s292_s27  }
   0x6   :  { %s20_s29 = sshll.u32 %s293_s28, 4  ;;  %s43_s7 = sshll.u32 %s347_s3, 4  ;;  %s21_s29 = int_to_ptr.vmem [resolvable:$true] %s20_s29  ;;  %s44_s7 = int_to_ptr.hbm [resolvable:$true] %s43_s7 }
   0x7   :  { %23 = dma.hbm_to_vmem [thread:$0]  %s19_s25, 128, %s21_s29, [#allocation4]  }
   0x8   :  { %s294_s1 = smov [#allocation8]  }
   0x9   :  { %s45_s8 = sshll.u32 %s294_s1, 4  ;;  %s46_s8 = int_to_ptr.vmem [resolvable:$true] %s45_s8 }
   0xa   :  { %51 = dma.hbm_to_vmem [thread:$0]  %s44_s7, 2048, %s46_s8, [#allocation7], %s291_s26, %s291_s26, %s292_s27  }
   0xb   :  { %284 = dma.done.wait [#allocation4], 128  }
   0xc   :  { %285 = vsyncadd [#allocation4], 4294967168 }
   0xd   :  { %286 = dma.done.wait [#allocation7], 4096  }
   0xe   :  { %287 = vsyncadd [#allocation7], 4294963200  ;;  %v87_v0 = vld [vmem:[#allocation6 + $0x78] sm:$0xff]  ;;  %v86_v1 = vld [vmem:[#allocation6 + $0x70] sm:$0xff]  ;;  %s295_s11 = smov [#allocation9]   ;;  %s169_s15 = sshll.u32 %s349_s5, 4  ;;  %s170_s15 = int_to_ptr.hbm [resolvable:$true] %s169_s15 }
   0xf   :  { %92 = vmatpush.msra.mxu0 %v87_v0  ;;  %v85_v2 = vld [vmem:[#allocation6 + $0x68] sm:$0xff]  ;;  %v84_v3 = vld [vmem:[#allocation6 + $0x60] sm:$0xff]  ;;  %v129_v4 = vld [vmem:[#allocation8 + $0x78] sm:$0xff]  ;;  %s167_s12 = sshll.u32 %s295_s11, 4  ;;  %s168_s12 = int_to_ptr.vmem [resolvable:$true] %s167_s12 }
  0x10   :  { %v83_v5 = vld [vmem:[#allocation6 + $0x58] sm:$0xff]  ;;  %130 = vmatpush.msra.mxu1 %v129_v4  ;;  %v128_v6 = vld [vmem:[#allocation8 + $0x70] sm:$0xff]  ;;  %v127_v7 = vld [vmem:[#allocation8 + $0x68] sm:$0xff] }
  0x11   :  { %93 = vmatpush.msra.mxu0 %v86_v1  ;;  %v82_v8 = vld [vmem:[#allocation6 + $0x50] sm:$0xff]  ;;  %v126_v9 = vld [vmem:[#allocation8 + $0x60] sm:$0xff]  ;;  %v81_v10 = vld [vmem:[#allocation6 + $0x48] sm:$0xff] }
  0x12   :  { %131 = vmatpush.msra.mxu1 %v128_v6  ;;  %v125_v11 = vld [vmem:[#allocation8 + $0x58] sm:$0xff]  ;;  %v80_v12 = vld [vmem:[#allocation6 + $0x40] sm:$0xff]  ;;  %v124_v13 = vld [vmem:[#allocation8 + $0x50] sm:$0xff] }
  0x13   :  { %94 = vmatpush.msra.mxu0 %v85_v2  ;;  %v79_v14 = vld [vmem:[#allocation6 + $0x38] sm:$0xff]  ;;  %v123_v15 = vld [vmem:[#allocation8 + $0x48] sm:$0xff]  ;;  %v78_v16 = vld [vmem:[#allocation6 + $0x30] sm:$0xff] }
  0x14   :  { %132 = vmatpush.msra.mxu1 %v127_v7  ;;  %v122_v17 = vld [vmem:[#allocation8 + $0x40] sm:$0xff]  ;;  %v77_v18 = vld [vmem:[#allocation6 + $0x28] sm:$0xff]  ;;  %v121_v19 = vld [vmem:[#allocation8 + $0x38] sm:$0xff] }
  0x15   :  { %95 = vmatpush.msra.mxu0 %v84_v3  ;;  %v76_v20 = vld [vmem:[#allocation6 + $0x20] sm:$0xff]  ;;  %v120_v21 = vld [vmem:[#allocation8 + $0x30] sm:$0xff]  ;;  %v75_v22 = vld [vmem:[#allocation6 + $0x18] sm:$0xff] }
  0x16   :  { %133 = vmatpush.msra.mxu1 %v126_v9  ;;  %v119_v23 = vld [vmem:[#allocation8 + $0x28] sm:$0xff]  ;;  %v74_v24 = vld [vmem:[#allocation6 + $0x10] sm:$0xff]  ;;  %v118_v25 = vld [vmem:[#allocation8 + $0x20] sm:$0xff] }
  0x17   :  { %96 = vmatpush.msra.mxu0 %v83_v5  ;;  %v73_v26 = vld [vmem:[#allocation6 + $0x8] sm:$0xff]  ;;  %v117_v27 = vld [vmem:[#allocation8 + $0x18] sm:$0xff]  ;;  %v72_v28 = vld [vmem:[#allocation6] sm:$0xff] }
  0x18   :  { %134 = vmatpush.msra.mxu1 %v125_v11  ;;  %v71_v29 = vld [vmem:[#allocation3] sm:$0xff]  ;;  %v116_v30 = vld [vmem:[#allocation8 + $0x10] sm:$0xff]  ;;  %v115_v31 = vld [vmem:[#allocation8 + $0x8] sm:$0xff] }
  0x19   :  { %97 = vmatpush.msra.mxu0 %v82_v8  ;;  %v114_v32 = vld [vmem:[#allocation8] sm:$0xff]  ;;  %v186_v33 = vld [vmem:[%s346_s2] ss:$0 sm:$0xff] }
  0x1a   :  { %135 = vmatpush.msra.mxu1 %v124_v13  ;;  %v187_v37 = vld [vmem:[%s348_s4] ss:$0 sm:$0xff] }
  0x1b   :  { %98 = vmatpush.msra.mxu0 %v81_v10 }
  0x1c   :  { %136 = vmatpush.msra.mxu1 %v123_v15 }
  0x1d   :  { %99 = vmatpush.msra.mxu0 %v80_v12 }
  0x1e   :  { %137 = vmatpush.msra.mxu1 %v122_v17 }
  0x1f   :  { %100 = vmatpush.msra.mxu0 %v79_v14 }
  0x20   :  { %138 = vmatpush.msra.mxu1 %v121_v19 }
  0x21   :  { %101 = vmatpush.msra.mxu0 %v78_v16 }
  0x22   :  { %139 = vmatpush.msra.mxu1 %v120_v21 }
  0x23   :  { %102 = vmatpush.msra.mxu0 %v77_v18 }
  0x24   :  { %140 = vmatpush.msra.mxu1 %v119_v23 }
  0x25   :  { %103 = vmatpush.msra.mxu0 %v76_v20 }
  0x26   :  { %141 = vmatpush.msra.mxu1 %v118_v25 }
  0x27   :  { %104 = vmatpush.msra.mxu0 %v75_v22 }
  0x28   :  { %142 = vmatpush.msra.mxu1 %v117_v27 }
  0x29   :  { %105 = vmatpush.msra.mxu0 %v74_v24 }
  0x2a   :  { %143 = vmatpush.msra.mxu1 %v116_v30 }
  0x2b   :  { %106 = vmatpush.msra.mxu0 %v73_v26 }
  0x2c   :  { %144 = vmatpush.msra.mxu1 %v115_v31 }
  0x2d   :  { %107 = vmatpush.msra.mxu0 %v72_v28 }
  0x2e   :  { %108 = vmatmul.f32.vlgmr.msra.gmra.mxu0 %v71_v29  ;;  %145 = vmatpush.msra.mxu1 %v114_v32 }
  0xab   :  { %v109_v34 = vpop.f32.mrf.mxu0 }
  0xac   :  { %v110_v35 = vadd.f32 %v186_v33, %v109_v34 }
  0xae   :  { %v112_v36 = vmax.f32 %v110_v35, 0.0 }
  0xb0   :  { %146 = vmatmul.f32.vlgmr.msra.gmra.mxu1 %v112_v36 }
 0x12d   :  { %v147_v38 = vpop.f32.mrf.mxu1 }
 0x12e   :  { %v160_v39 = vadd.f32 %v187_v37, %v147_v38 }
 0x130   :  { %161 = vst [vmem:[#allocation9] sm:$0xff] %v160_v39 }
 0x131   :  { %172 = dma.vmem_to_hbm [thread:$0]  %s168_s12, 128, %s170_s15, [#allocation5]  }
 0x132   :  { %288 = dma.done.wait [#allocation5], 128  }
 0x133   :  { %289 = vsyncadd [#allocation5], 4294967168 }
 0x134   :  { %177 = vsyncpa [#allocation4], 1 }
 0x135   :  { %178 = vsyncpa [#allocation7], 1 }
 0x136   :  { %179 = vsyncpa [#allocation5], 1 }

</bundles_post_ra>
